<compile_context>
chip_gen: v7x
topology: tpu7x:2x2x1
jax: 0.10.0
libtpu: 0.0.40
codegen_flags: <defaults>
</compile_context>

<pallas_src>
import functools

import jax
import jax.numpy as jnp
from jax.experimental import pallas as pl
from jax.experimental.pallas import tpu as pltpu

_LANE = 128  # lane width / MXU alignment

# Per-TensorCore VMEM capacity (v5e/v6e: 128 MiB, v7x: 64 MiB).
try:
    _VMEM_BYTES = int(pltpu.get_tpu_info().vmem_capacity_bytes)
except Exception:  # conservative fallback = v7x per-TC capacity
    _VMEM_BYTES = 64 << 20

# Usable scoped-VMEM budget: ~75% of physical, always leaving >= 8 MiB headroom
# for compiler-internal scratch / semaphores (v7x: 48 MiB, v5e/v6e: 96 MiB).
_VMEM_BUDGET = min(int(0.75 * _VMEM_BYTES), _VMEM_BYTES - (8 << 20))


def _round_up(x, m):
    return (x + m - 1) // m * m


def prepare_weights(w1, w2, compute_dtype=jnp.bfloat16):
    """One-time weight prep (hoisted out of the per-call hot path).

    w1: [hidden, in]  (PyTorch fc1.weight layout)
    w2: [out, hidden] (PyTorch fc2.weight layout)
    Returns (w1t_p, w2t_p): transposed, zero-padded to 128 (lane) multiples and
    cast to `compute_dtype`:  w1t_p [IN_p, HID_p],  w2t_p [HID_p, OUT_p].
    Zero padding is exact for this network: relu(0) == 0 and zero weight
    rows/cols contribute nothing to either matmul.
    """
    hid, in_f = w1.shape
    out_f, hid2 = w2.shape
    assert hid == hid2
    in_p = _round_up(in_f, _LANE)   # 128-multiple only (review fix: never 512)
    hid_p = _round_up(hid, _LANE)
    out_p = _round_up(out_f, _LANE)
    w1t_p = jnp.pad(w1.T.astype(compute_dtype),
                    ((0, in_p - in_f), (0, hid_p - hid)))
    w2t_p = jnp.pad(w2.T.astype(compute_dtype),
                    ((0, hid_p - hid), (0, out_p - out_f)))
    return w1t_p, w2t_p


def _ds_resident_kernel(x_ref, w1t_ref, w2t_ref, o_ref):
    # x_ref:   (TM, IN_P)      row tile of input (full feature width)
    # w1t_ref: (IN_P, HID_P)   fc1 weight, VMEM-resident (constant block index)
    # w2t_ref: (HID_P, OUT_P)  fc2 weight, VMEM-resident
    # o_ref:   (TM, OUT_P)     output tile
    xv = x_ref[...].astype(w1t_ref.dtype)           # no-op if dtypes match
    h = jnp.dot(xv, w1t_ref[...], preferred_element_type=jnp.float32)
    h = jnp.maximum(h, 0.0)                         # ReLU in f32
    y = jnp.dot(h.astype(w2t_ref.dtype), w2t_ref[...],
                preferred_element_type=jnp.float32)
    o_ref[...] = y.astype(o_ref.dtype)


def _ds_ktiled_kernel(x_ref, w1t_ref, w2t_ref, o_ref, h_acc_ref):
    # Fallback for very large IN (fc1 weight does not fit the VMEM budget):
    # contraction tiled over grid axis 1 with a persistent f32 accumulator.
    # x_ref:     (TM, TK)        row tile, K-chunk of features
    # w1t_ref:   (TK, HID_P)     fc1 weight chunk
    # w2t_ref:   (HID_P, OUT_P)  fc2 weight (resident)
    # o_ref:     (TM, OUT_P)     output tile (revisited across k, written once)
    # h_acc_ref: (TM, HID_P)     f32 VMEM accumulator for fc1
    k = pl.program_id(1)

    @pl.when(k == 0)
    def _init():
        h_acc_ref[...] = jnp.zeros_like(h_acc_ref)

    xv = x_ref[...].astype(w1t_ref.dtype)
    h_acc_ref[...] += jnp.dot(xv, w1t_ref[...],
                              preferred_element_type=jnp.float32)

    @pl.when(k == pl.num_programs(1) - 1)
    def _finalize():
        h = jnp.maximum(h_acc_ref[...], 0.0)        # ReLU in f32
        y = jnp.dot(h.astype(w2t_ref.dtype), w2t_ref[...],
                    preferred_element_type=jnp.float32)
        o_ref[...] = y.astype(o_ref.dtype)


@functools.partial(jax.jit, static_argnames=("out_features", "path"))
def deep_semantics_forward(x, w1t_p, w2t_p, out_features, path="auto"):
    """x: [N, in_features]; w1t_p/w2t_p from prepare_weights().

    path: "auto" (default), "resident", or "ktiled" (testing/override).
    """
    n, in_f = x.shape
    in_p, hid_p = w1t_p.shape
    out_p = w2t_p.shape[1]
    compute_dtype = w1t_p.dtype
    w_bpe = jnp.dtype(compute_dtype).itemsize
    out_bpe = jnp.dtype(x.dtype).itemsize

    # Row tile: 128 while N <= 512 (keeps >= 2 balanced row tiles so both v7x
    # TensorCores get work), 256 for larger batches (full-width feeds of the
    # 256-wide MXU on v6e/v7x).
    tm = 128 if _round_up(n, _LANE) <= 512 else 256
    n_pad = _round_up(n, tm)

    # Pad/cast x only when actually needed.
    needs_pad = (n_pad != n) or (in_p != in_f)
    if needs_pad:
        # Cast first (halves the padded-copy write for bf16), then zero-pad.
        xc = jnp.pad(x.astype(compute_dtype),
                     ((0, n_pad - n), (0, in_p - in_f)))
    else:
        # No extra HBM copy: the kernel casts tiles to the compute dtype in VMEM.
        xc = x
    x_bpe = jnp.dtype(xc.dtype).itemsize
    grid_rows = n_pad // tm

    def est_resident():
        return (2 * tm * in_p * x_bpe        # x tiles (double-buffered)
                + 2 * in_p * hid_p * w_bpe   # w1t (constant index; 2 bufs default)
                + 2 * hid_p * out_p * w_bpe  # w2t (constant index; 2 bufs default)
                + 2 * tm * out_p * out_bpe   # output tiles
                + tm * hid_p * 4)            # f32 intermediate h

    def est_ktiled(tk):
        return (2 * tm * tk * x_bpe
                + 2 * tk * hid_p * w_bpe
                + 2 * hid_p * out_p * w_bpe
                + 2 * tm * out_p * out_bpe
                + tm * hid_p * 4)            # f32 accumulator scratch

    def limit(est):
        return min(max(int(est * 1.5) + (4 << 20), 16 << 20), _VMEM_BUDGET)

    def fits(est):
        return int(est * 1.5) + (4 << 20) <= _VMEM_BUDGET

    use_resident = (path == "resident") or (path == "auto" and fits(est_resident()))

    if use_resident:
        # Fast path: weights fetched once and held VMEM-resident; pure x/y
        # streaming at the HBM roofline; no accumulator init/RMW passes.
        y_pad = pl.pallas_call(
            _ds_resident_kernel,
            out_shape=jax.ShapeDtypeStruct((n_pad, out_p), x.dtype),
            grid_spec=pltpu.PrefetchScalarGridSpec(
                num_scalar_prefetch=0,
                grid=(grid_rows,),
                in_specs=[
                    pl.BlockSpec((tm, in_p), lambda i: (i, 0)),
                    pl.BlockSpec((in_p, hid_p), lambda i: (0, 0)),
                    pl.BlockSpec((hid_p, out_p), lambda i: (0, 0)),
                ],
                out_specs=pl.BlockSpec((tm, out_p), lambda i: (i, 0)),
            ),
            compiler_params=pltpu.CompilerParams(
                dimension_semantics=("parallel",),
                vmem_limit_bytes=limit(est_resident())),
        )(xc, w1t_p, w2t_p)
    else:
        # Contraction (IN) tile: largest 128-multiple divisor of IN_p that fits
        # the budget (v5e/v6e's 128 MiB allows much larger tk than v7x's 64 MiB).
        tk = _LANE
        for cand in (2048, 1536, 1024, 768, 512, 384, 256, 128):
            if in_p % cand == 0 and fits(est_ktiled(cand)):
                tk = cand
                break
        # TODO(synk): if hid_p*out_p ever outgrows the VMEM budget, w2 needs its
        # own grid axis (tile OUT); not needed for realistic DeepSemantics dims.
        y_pad = pl.pallas_call(
            _ds_ktiled_kernel,
            out_shape=jax.ShapeDtypeStruct((n_pad, out_p), x.dtype),
            grid_spec=pltpu.PrefetchScalarGridSpec(
                num_scalar_prefetch=0,
                grid=(grid_rows, in_p // tk),
                in_specs=[
                    pl.BlockSpec((tm, tk), lambda i, k: (i, k)),
                    pl.BlockSpec((tk, hid_p), lambda i, k: (k, 0)),
                    pl.BlockSpec((hid_p, out_p), lambda i, k: (0, 0)),
                ],
                out_specs=pl.BlockSpec((tm, out_p), lambda i, k: (i, 0)),
                scratch_shapes=[pltpu.VMEM((tm, hid_p), jnp.float32)],
            ),
            compiler_params=pltpu.CompilerParams(
                dimension_semantics=("parallel", "arbitrary"),
                vmem_limit_bytes=limit(est_ktiled(tk))),
        )(xc, w1t_p, w2t_p)

    return y_pad[:n, :out_features]


if __name__ == "__main__":
    # Small shapes consistent with the module: N rows, two linear layers.
    N, IN, HID, OUT = 8, 32, 64, 16

    key = jax.random.PRNGKey(0)
    kx, k1, k2 = jax.random.split(key, 3)

    x = jax.random.normal(kx, (N, IN), dtype=jnp.float32)
    # Deterministic parameter init (PyTorch-Linear-like uniform scaling),
    # stored in PyTorch layout: w1 [hidden, in], w2 [out, hidden].
    w1 = jax.random.uniform(k1, (HID, IN), dtype=jnp.float32,
                            minval=-1.0, maxval=1.0) / jnp.sqrt(IN)
    w2 = jax.random.uniform(k2, (OUT, HID), dtype=jnp.float32,
                            minval=-1.0, maxval=1.0) / jnp.sqrt(HID)

    # Pure-JAX reference of the PyTorch forward (norm=False path), f32.
    y_ref = jnp.maximum(x @ w1.T, 0.0) @ w2.T

    # f32 path, resident-weights kernel (the default path for small models).
    w1t_f32, w2t_f32 = prepare_weights(w1, w2, compute_dtype=jnp.float32)
    y_f32 = jax.block_until_ready(deep_semantics_forward(x, w1t_f32, w2t_f32, OUT))
    assert y_f32.shape == (N, OUT)
    assert jnp.allclose(y_f32, y_ref, atol=1e-4, rtol=1e-4), "f32 resident mismatch"

    # Exercise the k-tiled fallback kernel (large-IN path) to keep it tested.
    y_kt = jax.block_until_ready(
        deep_semantics_forward(x, w1t_f32, w2t_f32, OUT, path="ktiled"))
    assert jnp.allclose(y_kt, y_ref, atol=1e-4, rtol=1e-4), "f32 k-tiled mismatch"

    # bf16 MXU path (default performance config): bf16 inputs, f32 accumulation.
    w1t_bf, w2t_bf = prepare_weights(w1, w2, compute_dtype=jnp.bfloat16)
    y_bf = jax.block_until_ready(deep_semantics_forward(x, w1t_bf, w2t_bf, OUT))
    assert y_bf.shape == (N, OUT)
    assert jnp.allclose(y_bf, y_ref, atol=5e-2, rtol=5e-2), "bf16 mismatch vs reference"

    print("KERNEL_OK")
</pallas_src>

<mosaic_0001>
module attributes {stable_mosaic.version = 11 : i64} {
  func.func @_ds_resident_kernel(%arg0: i32, %arg1: memref<128x128xf32, #tpu.memory_space<vmem>>, %arg2: memref<128x128xf32, #tpu.memory_space<vmem>>, %arg3: memref<128x128xf32, #tpu.memory_space<vmem>>, %arg4: memref<128x128xf32, #tpu.memory_space<vmem>>) attributes {dimension_semantics = [#tpu.dimension_semantics<parallel>], iteration_bounds = array<i64: 1>, scalar_prefetch = 0 : i64, scratch_operands = 0 : i64, tpu.core_type = #tpu.core_type<tc>, window_params = [{transform_indices = @transform_0, window_bounds = array<i64: 128, 128>}, {pipeline_mode = #tpu.pipeline_mode<synchronous>, transform_indices = @transform_1, window_bounds = array<i64: 128, 128>}, {pipeline_mode = #tpu.pipeline_mode<synchronous>, transform_indices = @transform_2, window_bounds = array<i64: 128, 128>}, {transform_indices = @transform_3, window_bounds = array<i64: 128, 128>}]} {
    %c0 = arith.constant 0 : index
    %c0_0 = arith.constant 0 : index
    %0 = vector.load %arg1[%c0, %c0_0] : memref<128x128xf32, #tpu.memory_space<vmem>>, vector<128x128xf32>
    %c0_1 = arith.constant 0 : index
    %c0_2 = arith.constant 0 : index
    %1 = vector.load %arg2[%c0_1, %c0_2] : memref<128x128xf32, #tpu.memory_space<vmem>>, vector<128x128xf32>
    %cst = arith.constant dense<0.000000e+00> : vector<128x128xf32>
    %2 = tpu.matmul %0, %1, %cst {dimension_numbers = #tpu.dot_dimension_numbers<[1], [0], [0], [1], [0, 0, 1, 1], [], []>} : vector<128x128xf32>, vector<128x128xf32>, vector<128x128xf32> -> vector<128x128xf32>
    %cst_3 = arith.constant 0.000000e+00 : f32
    %3 = vector.broadcast %cst_3 : f32 to vector<128x128xf32>
    %4 = arith.maximumf %2, %3 : vector<128x128xf32>
    %c0_4 = arith.constant 0 : index
    %c0_5 = arith.constant 0 : index
    %5 = vector.load %arg3[%c0_4, %c0_5] : memref<128x128xf32, #tpu.memory_space<vmem>>, vector<128x128xf32>
    %cst_6 = arith.constant dense<0.000000e+00> : vector<128x128xf32>
    %6 = tpu.matmul %4, %5, %cst_6 {dimension_numbers = #tpu.dot_dimension_numbers<[1], [0], [0], [1], [0, 0, 1, 1], [], []>} : vector<128x128xf32>, vector<128x128xf32>, vector<128x128xf32> -> vector<128x128xf32>
    %c0_7 = arith.constant 0 : index
    %c0_8 = arith.constant 0 : index
    %7 = vector.load %arg4[%c0_7, %c0_8] : memref<128x128xf32, #tpu.memory_space<vmem>>, vector<128x128xf32>
    tpu.vector_store %arg4[%c0_7, %c0_8], %6 {strides = array<i32>} : memref<128x128xf32, #tpu.memory_space<vmem>>, vector<128x128xf32>,
    return
  }
  func.func @transform_0(%arg0: i32) -> (i32, i32) {
    %c0_i32 = arith.constant 0 : i32
    %c0_i32_0 = arith.constant 0 : i32
    return %arg0, %c0_i32 : i32, i32
  }
  func.func @transform_1(%arg0: i32) -> (i32, i32) {
    %c0_i32 = arith.constant 0 : i32
    %c0_i32_0 = arith.constant 0 : i32
    %c0_i32_1 = arith.constant 0 : i32
    return %c0_i32, %c0_i32_0 : i32, i32
  }
  func.func @transform_2(%arg0: i32) -> (i32, i32) {
    %c0_i32 = arith.constant 0 : i32
    %c0_i32_0 = arith.constant 0 : i32
    %c0_i32_1 = arith.constant 0 : i32
    return %c0_i32, %c0_i32_0 : i32, i32
  }
  func.func @transform_3(%arg0: i32) -> (i32, i32) {
    %c0_i32 = arith.constant 0 : i32
    %c0_i32_0 = arith.constant 0 : i32
    return %arg0, %c0_i32 : i32, i32
  }
}

</mosaic_0001>

<bundles_post_ra>
// kernel: deep_semantics_forward.1
= control target key start
LH: loop header
LB: loop body
LE: loop exit
PB: predicated region body
PF: predicated region fallthrough
CT: control target
= control target key end

     0   :  { %8 = vsyncpa [#allocation3], 0  ;;  %s670_s12 = smov [#allocation2]   ;;  %s849_s0 = inlined_call_operand.vmem [shape: f32[128,128], index: 0, kind: input, shape index: {}]   ;;  %s850_s1 = inlined_call_operand.vmem [shape: f32[128,128], index: 1, kind: input, shape index: {}]   ;;  %s851_s2 = inlined_call_operand.hbm [shape: f32[128,128], index: 2, kind: input, shape index: {}]   ;;  %s852_s3 = inlined_call_operand.vmem [shape: f32[128,128], index: 3, kind: output, shape index: {}]  }
   0x1   :  { %s18_s13 = sshll.u32 %s670_s12, 4  ;;  %s646_s16 = scalar_lea.hbm %s851_s2, 2048  ;;  %s19_s13 = int_to_ptr.vmem [resolvable:$true] %s18_s13 }
   0x2   :  { %p647_p0 = scmp.ne.s32.totalorder %s851_s2, %s646_s16  ;;  %p650_p1 = scmp.lt.u32.totalorder %s646_s16, %s851_s2 }
   0x4   :  { %p652_p2 = pnand %p650_p1, %p647_p0 }
   0x6   :  { %655 = shalt.err (!%p652_p2)
}
   0x7   :  { %s656_s21 = scalar_lea.vmem %s19_s13, 2048  ;;  %p661_p4 = scmp.lt.s32.totalorder %s19_s13, %s19_s13 }
   0x8   :  { %p657_p3 = scmp.ne.s32.totalorder %s19_s13, %s656_s21  ;;  %p662_p5 = scmp.lt.s32.totalorder %s656_s21, %s656_s21 }
   0xa   :  { %p663_p6 = por %p662_p5, %p661_p4 }
   0xc   :  { %p664_p7 = pnand %p663_p6, %p657_p3 }
   0xe   :  { %667 = shalt.err (!%p664_p7)
}
   0xf   :  { %s671_s22 = smov 128   ;;  %s672_s23 = smov 8  }
  0x10   :  { %24 = dma.hbm_to_vmem [thread:$0]  %s851_s2, 2048, %s19_s13, [#allocation3], %s671_s22, %s671_s22, %s672_s23  }
  0x11   :  { %668 = dma.done.wait [#allocation3], 2048  }
  0x12   :  { %669 = vsyncadd [#allocation3], 4294965248  ;;  %v44_v0 = vld [vmem:[%s850_s1] sm:$0xff]  ;;  %v45_v1 = vld [vmem:[%s850_s1 + $0x8] sm:$0xff] }
  0x13   :  { %v46_v2 = vld [vmem:[%s850_s1 + $0x10] sm:$0xff]  ;;  %v579_v3 = vpack.c.bf16 %v45_v1, %v44_v0  ;;  %v47_v4 = vld [vmem:[%s850_s1 + $0x18] sm:$0xff]  ;;  %v48_v6 = vld [vmem:[%s850_s1 + $0x20] sm:$0xff] }
  0x14   :  { %v583_v5 = vpack.c.bf16 %v47_v4, %v46_v2  ;;  %v49_v7 = vld [vmem:[%s850_s1 + $0x28] sm:$0xff]  ;;  %v28_v9 = vld [vmem:[%s849_s0] sm:$0xff]  ;;  %v50_v10 = vld [vmem:[%s850_s1 + $0x30] sm:$0xff] }
  0x15   :  { %580 = vmatprep.subr.bf16.mxu0 %v579_v3  ;;  %v587_v8 = vpack.c.bf16 %v49_v7, %v48_v6  ;;  %v51_v11 = vld [vmem:[%s850_s1 + $0x38] sm:$0xff]  ;;  %499 = vmatprep.mubr.f32.mxu0 %v28_v9  ;;  %v52_v13 = vld [vmem:[%s850_s1 + $0x40] sm:$0xff]  ;;  %v53_v14 = vld [vmem:[%s850_s1 + $0x48] sm:$0xff] }
  0x16   :  { %582 = vmatpush3.bf16.msra.mxu0 %v579_v3  ;;  %v591_v12 = vpack.c.bf16 %v51_v11, %v50_v10  ;;  %v221_v15 = vld [vmem:[#allocation2] sm:$0xff]  ;;  %v222_v16 = vld [vmem:[#allocation2 + $0x8] sm:$0xff]  ;;  %v223_v17 = vld [vmem:[#allocation2 + $0x10] sm:$0xff]  ;;  %v595_v21 = vpack.c.bf16 %v53_v14, %v52_v13 }
  0x17   :  { %584 = vmatprep.subr.bf16.mxu0 %v583_v5  ;;  %v224_v18 = vld [vmem:[#allocation2 + $0x18] sm:$0xff]  ;;  %v611_v19 = vpack.c.bf16 %v222_v16, %v221_v15  ;;  %v225_v22 = vld [vmem:[#allocation2 + $0x20] sm:$0xff]  ;;  %v226_v23 = vld [vmem:[#allocation2 + $0x28] sm:$0xff] }
  0x18   :  { %v615_v20 = vpack.c.bf16 %v224_v18, %v223_v17  ;;  %v54_v24 = vld [vmem:[%s850_s1 + $0x50] sm:$0xff]  ;;  %v55_v25 = vld [vmem:[%s850_s1 + $0x58] sm:$0xff]  ;;  %v619_v26 = vpack.c.bf16 %v226_v23, %v225_v22  ;;  %v56_v30 = vld [vmem:[%s850_s1 + $0x60] sm:$0xff] }
  0x19   :  { %612 = vmatprep.subr.bf16.mxu1 %v611_v19  ;;  %v599_v27 = vpack.c.bf16 %v55_v25, %v54_v24  ;;  %v227_v28 = vld [vmem:[#allocation2 + $0x30] sm:$0xff]  ;;  %v228_v29 = vld [vmem:[#allocation2 + $0x38] sm:$0xff]  ;;  %v57_v31 = vld [vmem:[%s850_s1 + $0x68] sm:$0xff] }
  0x1a   :  { %586 = vmatpush3.bf16.msra.mxu0 %v583_v5  ;;  %614 = vmatpush3.bf16.msra.mxu1 %v611_v19  ;;  %v623_v32 = vpack.c.bf16 %v228_v29, %v227_v28  ;;  %v603_v33 = vpack.c.bf16 %v57_v31, %v56_v30  ;;  %v229_v34 = vld [vmem:[#allocation2 + $0x40] sm:$0xff]  ;;  %v230_v35 = vld [vmem:[#allocation2 + $0x48] sm:$0xff]  ;;  %v58_v36 = vld [vmem:[%s850_s1 + $0x70] sm:$0xff] }
  0x1b   :  { %588 = vmatprep.subr.bf16.mxu0 %v587_v8  ;;  %616 = vmatprep.subr.bf16.mxu1 %v615_v20  ;;  %v59_v37 = vld [vmem:[%s850_s1 + $0x78] sm:$0xff]  ;;  %v627_v38 = vpack.c.bf16 %v230_v35, %v229_v34  ;;  %v231_v40 = vld [vmem:[#allocation2 + $0x50] sm:$0xff]  ;;  %v233_v43 = vld [vmem:[#allocation2 + $0x60] sm:$0xff] }
  0x1c   :  { %v607_v39 = vpack.c.bf16 %v59_v37, %v58_v36  ;;  %v232_v41 = vld [vmem:[#allocation2 + $0x58] sm:$0xff]  ;;  %v234_v44 = vld [vmem:[#allocation2 + $0x68] sm:$0xff]  ;;  %v30_v47 = vld [vmem:[%s849_s0 + $0x10] sm:$0xff] }
  0x1d   :  { %v631_v42 = vpack.c.bf16 %v232_v41, %v231_v40  ;;  %v29_v45 = vld [vmem:[%s849_s0 + $0x8] sm:$0xff]  ;;  %v635_v46 = vpack.c.bf16 %v234_v44, %v233_v43  ;;  %v31_v48 = vld [vmem:[%s849_s0 + $0x18] sm:$0xff]  ;;  %v32_v49 = vld [vmem:[%s849_s0 + $0x20] sm:$0xff] }
  0x1e   :  { %590 = vmatpush3.bf16.msra.mxu0 %v587_v8  ;;  %618 = vmatpush3.bf16.msra.mxu1 %v615_v20  ;;  %v33_v50 = vld [vmem:[%s849_s0 + $0x28] sm:$0xff]  ;;  %v34_v51 = vld [vmem:[%s849_s0 + $0x30] sm:$0xff]  ;;  %v35_v52 = vld [vmem:[%s849_s0 + $0x38] sm:$0xff] }
  0x1f   :  { %592 = vmatprep.subr.bf16.mxu0 %v591_v12  ;;  %620 = vmatprep.subr.bf16.mxu1 %v619_v26  ;;  %v36_v53 = vld [vmem:[%s849_s0 + $0x40] sm:$0xff]  ;;  %v37_v54 = vld [vmem:[%s849_s0 + $0x48] sm:$0xff]  ;;  %v38_v55 = vld [vmem:[%s849_s0 + $0x50] sm:$0xff] }
  0x20   :  { %v39_v56 = vld [vmem:[%s849_s0 + $0x58] sm:$0xff]  ;;  %v40_v57 = vld [vmem:[%s849_s0 + $0x60] sm:$0xff]  ;;  %v41_v58 = vld [vmem:[%s849_s0 + $0x68] sm:$0xff] }
  0x21   :  { %v42_v59 = vld [vmem:[%s849_s0 + $0x70] sm:$0xff]  ;;  %v43_v60 = vld [vmem:[%s849_s0 + $0x78] sm:$0xff] }
  0x22   :  { %594 = vmatpush3.bf16.msra.mxu0 %v591_v12  ;;  %622 = vmatpush3.bf16.msra.mxu1 %v619_v26  ;;  %v235_v61 = vld [vmem:[#allocation2 + $0x70] sm:$0xff]  ;;  %v236_v62 = vld [vmem:[#allocation2 + $0x78] sm:$0xff] }
  0x23   :  { %596 = vmatprep.subr.bf16.mxu0 %v595_v21  ;;  %624 = vmatprep.subr.bf16.mxu1 %v623_v32  ;;  %v639_v63 = vpack.c.bf16 %v236_v62, %v235_v61 }
  0x26   :  { %598 = vmatpush3.bf16.msra.mxu0 %v595_v21  ;;  %626 = vmatpush3.bf16.msra.mxu1 %v623_v32 }
  0x27   :  { %600 = vmatprep.subr.bf16.mxu0 %v599_v27  ;;  %628 = vmatprep.subr.bf16.mxu1 %v627_v38 }
  0x2a   :  { %602 = vmatpush3.bf16.msra.mxu0 %v599_v27  ;;  %630 = vmatpush3.bf16.msra.mxu1 %v627_v38 }
  0x2b   :  { %604 = vmatprep.subr.bf16.mxu0 %v603_v33  ;;  %632 = vmatprep.subr.bf16.mxu1 %v631_v42 }
  0x2e   :  { %606 = vmatpush3.bf16.msra.mxu0 %v603_v33  ;;  %634 = vmatpush3.bf16.msra.mxu1 %v631_v42 }
  0x2f   :  { %608 = vmatprep.subr.bf16.mxu0 %v607_v39  ;;  %636 = vmatprep.subr.bf16.mxu1 %v635_v46 }
  0x32   :  { %610 = vmatpush3.bf16.msra.mxu0 %v607_v39  ;;  %638 = vmatpush3.bf16.msra.mxu1 %v635_v46 }
  0x33   :  { %640 = vmatprep.subr.bf16.mxu1 %v639_v63 }
  0x35   :  { %500 = vmatmul.mubr.f32.vlgmr.msra.gmra.mrb[0].mxu0 %v29_v45 }
  0x36   :  { %502 = vmatprep.mubr.f32.mxu0 %v30_v47  ;;  %642 = vmatpush3.bf16.msra.mxu1 %v639_v63 }
  0x39   :  { %503 = vmatmul.mubr.f32.gmra.mrb[2].mxu0 %v31_v48 }
  0x3a   :  { %505 = vmatprep.mubr.f32.mxu0 %v32_v49 }
  0x3d   :  { %506 = vmatmul.mubr.f32.gmra.mrb[4].mxu0 %v33_v50 }
  0x3e   :  { %508 = vmatprep.mubr.f32.mxu0 %v34_v51 }
  0x41   :  { %509 = vmatmul.mubr.f32.gmra.mrb[6].mxu0 %v35_v52 }
  0x42   :  { %511 = vmatprep.mubr.f32.mxu0 %v36_v53 }
  0x45   :  { %512 = vmatmul.mubr.f32.gmra.mrb[8].mxu0 %v37_v54 }
  0x46   :  { %514 = vmatprep.mubr.f32.mxu0 %v38_v55 }
  0x49   :  { %515 = vmatmul.mubr.f32.gmra.mrb[10].mxu0 %v39_v56 }
  0x4a   :  { %517 = vmatprep.mubr.f32.mxu0 %v40_v57 }
  0x4d   :  { %518 = vmatmul.mubr.f32.gmra.mrb[12].mxu0 %v41_v58 }
  0x4e   :  { %520 = vmatprep.mubr.f32.mxu0 %v42_v59 }
  0x51   :  { %521 = vmatmul.mubr.f32.gmra.mrb[14].mxu0 %v43_v60 }
 0x108   :  { %v501_v0 = vpop.f32.mrb[0].mxu0 }
 0x109   :  { %v126_v1 = vpop.f32.mrb[1].mxu0  ;;  %v206_v3 = vmax.f32 %v501_v0, 0.0 }
 0x10a   :  { %v205_v2 = vmax.f32 %v126_v1, 0.0 }
 0x10c   :  { %v504_v4 = vpop.f32.mrb[2].mxu0  ;;  %555 = vmatprep.mubr.f32.mxu1 %v205_v2 }
 0x10d   :  { %v136_v5 = vpop.f32.mrb[3].mxu0  ;;  %556 = vmatmul.mubr.f32.vlgmr.msra.gmra.mrb[0].mxu1 %v206_v3  ;;  %v208_v7 = vmax.f32 %v504_v4, 0.0 }
 0x10e   :  { %v207_v6 = vmax.f32 %v136_v5, 0.0 }
 0x110   :  { %v507_v8 = vpop.f32.mrb[4].mxu0  ;;  %558 = vmatprep.mubr.f32.mxu1 %v207_v6 }
 0x111   :  { %v146_v9 = vpop.f32.mrb[5].mxu0  ;;  %559 = vmatmul.mubr.f32.gmra.mrb[2].mxu1 %v208_v7  ;;  %v210_v11 = vmax.f32 %v507_v8, 0.0 }
 0x112   :  { %v209_v10 = vmax.f32 %v146_v9, 0.0 }
 0x114   :  { %v510_v12 = vpop.f32.mrb[6].mxu0  ;;  %561 = vmatprep.mubr.f32.mxu1 %v209_v10 }
 0x115   :  { %v156_v13 = vpop.f32.mrb[7].mxu0  ;;  %562 = vmatmul.mubr.f32.gmra.mrb[4].mxu1 %v210_v11  ;;  %v212_v15 = vmax.f32 %v510_v12, 0.0 }
 0x116   :  { %v211_v14 = vmax.f32 %v156_v13, 0.0 }
 0x118   :  { %v513_v16 = vpop.f32.mrb[8].mxu0  ;;  %564 = vmatprep.mubr.f32.mxu1 %v211_v14 }
 0x119   :  { %v166_v17 = vpop.f32.mrb[9].mxu0  ;;  %565 = vmatmul.mubr.f32.gmra.mrb[6].mxu1 %v212_v15  ;;  %v214_v19 = vmax.f32 %v513_v16, 0.0 }
 0x11a   :  { %v213_v18 = vmax.f32 %v166_v17, 0.0 }
 0x11c   :  { %v516_v20 = vpop.f32.mrb[10].mxu0  ;;  %567 = vmatprep.mubr.f32.mxu1 %v213_v18 }
 0x11d   :  { %v176_v21 = vpop.f32.mrb[11].mxu0  ;;  %568 = vmatmul.mubr.f32.gmra.mrb[8].mxu1 %v214_v19  ;;  %v216_v23 = vmax.f32 %v516_v20, 0.0 }
 0x11e   :  { %v215_v22 = vmax.f32 %v176_v21, 0.0 }
 0x120   :  { %v519_v24 = vpop.f32.mrb[12].mxu0  ;;  %570 = vmatprep.mubr.f32.mxu1 %v215_v22 }
 0x121   :  { %v186_v25 = vpop.f32.mrb[13].mxu0  ;;  %571 = vmatmul.mubr.f32.gmra.mrb[10].mxu1 %v216_v23  ;;  %v218_v27 = vmax.f32 %v519_v24, 0.0 }
 0x122   :  { %v217_v26 = vmax.f32 %v186_v25, 0.0 }
 0x124   :  { %v522_v28 = vpop.f32.mrb[14].mxu0  ;;  %573 = vmatprep.mubr.f32.mxu1 %v217_v26 }
 0x125   :  { %v196_v29 = vpop.f32.mrb[15].mxu0  ;;  %574 = vmatmul.mubr.f32.gmra.mrb[12].mxu1 %v218_v27  ;;  %v220_v31 = vmax.f32 %v522_v28, 0.0 }
 0x126   :  { %v219_v30 = vmax.f32 %v196_v29, 0.0 }
 0x128   :  { %576 = vmatprep.mubr.f32.mxu1 %v219_v30 }
 0x129   :  { %577 = vmatmul.mubr.f32.gmra.mrb[14].mxu1 %v220_v31 }
 0x1e0   :  { %v557_v32 = vpop.f32.mrb[0].mxu1 }
 0x1e1   :  { %383 = vst [vmem:[%s852_s3 + $0x8] sm:$0xff] %v557_v32  ;;  %v303_v33 = vpop.f32.mrb[1].mxu1 }
 0x1e2   :  { %382 = vst [vmem:[%s852_s3] sm:$0xff] %v303_v33 }
 0x1e4   :  { %v560_v34 = vpop.f32.mrb[2].mxu1 }
 0x1e5   :  { %385 = vst [vmem:[%s852_s3 + $0x18] sm:$0xff] %v560_v34  ;;  %v313_v35 = vpop.f32.mrb[3].mxu1 }
 0x1e6   :  { %384 = vst [vmem:[%s852_s3 + $0x10] sm:$0xff] %v313_v35 }
 0x1e8   :  { %v563_v36 = vpop.f32.mrb[4].mxu1 }
 0x1e9   :  { %387 = vst [vmem:[%s852_s3 + $0x28] sm:$0xff] %v563_v36  ;;  %v323_v37 = vpop.f32.mrb[5].mxu1 }
 0x1ea   :  { %386 = vst [vmem:[%s852_s3 + $0x20] sm:$0xff] %v323_v37 }
 0x1ec   :  { %v566_v38 = vpop.f32.mrb[6].mxu1 }
 0x1ed   :  { %389 = vst [vmem:[%s852_s3 + $0x38] sm:$0xff] %v566_v38  ;;  %v333_v39 = vpop.f32.mrb[7].mxu1 }
 0x1ee   :  { %388 = vst [vmem:[%s852_s3 + $0x30] sm:$0xff] %v333_v39 }
 0x1f0   :  { %v569_v40 = vpop.f32.mrb[8].mxu1 }
 0x1f1   :  { %391 = vst [vmem:[%s852_s3 + $0x48] sm:$0xff] %v569_v40  ;;  %v343_v41 = vpop.f32.mrb[9].mxu1 }
 0x1f2   :  { %390 = vst [vmem:[%s852_s3 + $0x40] sm:$0xff] %v343_v41 }
 0x1f4   :  { %v572_v42 = vpop.f32.mrb[10].mxu1 }
 0x1f5   :  { %393 = vst [vmem:[%s852_s3 + $0x58] sm:$0xff] %v572_v42  ;;  %v353_v43 = vpop.f32.mrb[11].mxu1 }
 0x1f6   :  { %392 = vst [vmem:[%s852_s3 + $0x50] sm:$0xff] %v353_v43 }
 0x1f8   :  { %v575_v44 = vpop.f32.mrb[12].mxu1 }
 0x1f9   :  { %395 = vst [vmem:[%s852_s3 + $0x68] sm:$0xff] %v575_v44  ;;  %v363_v45 = vpop.f32.mrb[13].mxu1 }
 0x1fa   :  { %394 = vst [vmem:[%s852_s3 + $0x60] sm:$0xff] %v363_v45 }
 0x1fc   :  { %v578_v46 = vpop.f32.mrb[14].mxu1 }
 0x1fd   :  { %397 = vst [vmem:[%s852_s3 + $0x78] sm:$0xff] %v578_v46  ;;  %v373_v47 = vpop.f32.mrb[15].mxu1 }
 0x1fe   :  { %396 = vst [vmem:[%s852_s3 + $0x70] sm:$0xff] %v373_v47 }
 0x1ff   :  { %402 = vsyncpa [#allocation3], 1 }

</bundles_post_ra>
